<compile_context>
chip_gen: v7x
topology: tpu7x:2x2x1
jax: 0.10.0
libtpu: 0.0.40
codegen_flags: <defaults>
</compile_context>

<pallas_src>
import functools

import jax
import jax.numpy as jnp
from jax import lax
from jax.experimental import pallas as pl
from jax.experimental.pallas import tpu as pltpu

BN_EPS = 1e-5
LANE = 128                        # channel dims padded to a multiple of this
VMEM_LIMIT = 40 * 1024 * 1024     # < 64 MiB (v7x physical per TC), fits all gens
ACC_BYTES = 64 * 1024             # target f32 accumulator footprint (~16 vregs)


def round_up(x, m):
    return (x + m - 1) // m * m


def cdiv(a, b):
    return (a + b - 1) // b


def pad_axis(a, axis, target):
    if a.shape[axis] == target:
        return a
    widths = [(0, 0)] * a.ndim
    widths[axis] = (0, target - a.shape[axis])
    return jnp.pad(a, widths)


def _full_spec(shape):
    nd = len(shape)
    return pl.BlockSpec(shape, lambda *args, _nd=nd: (0,) * _nd)


# ------------------------------ stem matmul kernel ------------------------------

def _mm_bias_act_kernel(act, x_ref, w_ref, b_ref, o_ref):
    """One (TM, TN) output tile: act(x @ w + bias).  BN scale is folded into w."""
    y = jnp.dot(x_ref[...], w_ref[...], preferred_element_type=jnp.float32)
    y = y + b_ref[...]
    if act == "relu6":
        y = jnp.clip(y, 0.0, 6.0)
    elif act == "relu":
        y = jnp.maximum(y, 0.0)
    o_ref[...] = y.astype(o_ref.dtype)


@functools.partial(jax.jit, static_argnames=("act",))
def matmul_bias_act(x, w, bias, *, act="none"):
    """x:(M,K) @ w:(K,Np) + bias:(1,Np); Np is a multiple of 128 (lane-dense)."""
    M, K = x.shape
    K2, Np = w.shape
    assert K == K2 and Np % LANE == 0

    # Adaptive row tile: bigger tiles when K is small so each x tile is ~1 MiB,
    # rounded to 16 (bf16 sublane packing); force >=2 row tiles when possible so
    # both v7x TensorCores get work along the "parallel" M axis.
    if K <= 256:
        tm_target = 2048
    elif K <= 640:
        tm_target = 1024
    else:
        tm_target = 512
    TM = min(tm_target, round_up(max(M, 16), 16))
    if round_up(M, TM) // TM < 2 and M >= 32:
        TM = round_up(cdiv(M, 2), 16)
    Mp = round_up(M, TM)

    if Np <= 256:
        TN = Np
    elif Np % 256 == 0:
        TN = 256
    else:
        TN = LANE
    grid = (Mp // TM, Np // TN)

    xb = x.astype(jnp.bfloat16)
    if Mp != M:
        xb = jnp.pad(xb, ((0, Mp - M), (0, 0)))

    out = pl.pallas_call(
        functools.partial(_mm_bias_act_kernel, act),
        out_shape=jax.ShapeDtypeStruct((Mp, Np), jnp.bfloat16),
        grid=grid,
        in_specs=[
            pl.BlockSpec((TM, K), lambda i, j: (i, 0)),
            pl.BlockSpec((K, TN), lambda i, j: (0, j)),
            pl.BlockSpec((1, TN), lambda i, j: (0, j)),
        ],
        out_specs=pl.BlockSpec((TM, TN), lambda i, j: (i, j)),
        compiler_params=pltpu.CompilerParams(
            dimension_semantics=("parallel", "parallel"),
            vmem_limit_bytes=VMEM_LIMIT,
        ),
    )(xb, w, bias)
    if Mp != M:
        out = out[:M]
    return out


# -------------------- fused inverted-residual block kernel --------------------

def _chunk_rows(hid_p, total):
    """Row-chunk size keeping the (chunk, hid_p) f32 accumulator ~16 vregs."""
    rows = max(8, (ACC_BYTES // (hid_p * 4)) // 8 * 8)
    return min(total, rows)


def _foreach_chunk(total, chunk, fn):
    """fn(o0, L) over [0, total) rows; static unroll when short, fori otherwise."""
    n_full = total // chunk
    rem = total - n_full * chunk
    if n_full <= 8:
        for i in range(n_full):
            fn(i * chunk, chunk)
    else:
        def body(i, carry):
            fn(pl.multiple_of(i * chunk, chunk), chunk)
            return carry
        lax.fori_loop(0, n_full, body, 0, unroll=False)
    if rem:
        fn(n_full * chunk, rem)


def _block_kernel(expand, use_res, stride, H, W, *refs):
    """One image of an inverted-residual block, fully in VMEM.

    Layout: the (BN+ReLU6'd) hidden activation is stored flattened in a VMEM
    scratch of (H+4)*W rows with 2*W zeroed halo rows at the top and bottom;
    depthwise taps are then contiguous (stride 1) or strided (stride 2) row
    slices, and out-of-range columns are masked with iota-based masks.
    """
    idx = 0
    x_ref = refs[idx]; idx += 1
    if expand:
        we_ref, be_ref = refs[idx], refs[idx + 1]; idx += 2
    wd_ref, bd_ref = refs[idx], refs[idx + 1]; idx += 2
    wp_ref, bp_ref = refs[idx], refs[idx + 1]; idx += 2
    o_ref, hid_ref = refs[idx], refs[idx + 1]

    HW = H * W
    Ho = (H - 1) // stride + 1
    Wo = (W - 1) // stride + 1
    Hid = hid_ref.shape[-1]
    chunk = _chunk_rows(Hid, HW)

    # zero the flattened row-halo regions of the hidden scratch
    zeros = jnp.zeros((2 * W, Hid), dtype=hid_ref.dtype)
    hid_ref[pl.ds(0, 2 * W), :] = zeros
    hid_ref[pl.ds((H + 2) * W, 2 * W), :] = zeros

    # ---- phase 1: 1x1 expand conv (+folded BN + ReLU6) -> hidden scratch ----
    def expand_chunk(o0, L):
        xin = x_ref[0, pl.ds(o0, L), :]
        if expand:
            y = jnp.dot(xin, we_ref[...], preferred_element_type=jnp.float32)
            y = jnp.clip(y + be_ref[...], 0.0, 6.0).astype(hid_ref.dtype)
        else:
            y = xin.astype(hid_ref.dtype)
        hid_ref[pl.ds(2 * W + o0, L), :] = y

    _foreach_chunk(HW, chunk, expand_chunk)

    # ---- phase 2: depthwise 3x3 (+BN+ReLU6), 1x1 project (+bias, residual) ----
    w9 = wd_ref[...]        # (9, Hid) f32, BN scale folded; kept f32 for v5e VALU
    b_dw = bd_ref[...]      # (1, Hid) f32
    b_pj = bp_ref[...]      # (1, Cout) f32

    def project_store(acc, o0, L):
        dw = jnp.clip(acc + b_dw, 0.0, 6.0).astype(jnp.bfloat16)
        y = jnp.dot(dw, wp_ref[...], preferred_element_type=jnp.float32) + b_pj
        if use_res:
            y = y + x_ref[0, pl.ds(o0, L), :].astype(jnp.float32)
        o_ref[0, pl.ds(o0, L), :] = y.astype(o_ref.dtype)

    if stride == 1:
        def dw_chunk(o0, L):
            pos = o0 + lax.broadcasted_iota(jnp.int32, (L, 1), 0)
            if W & (W - 1) == 0:
                col = jnp.bitwise_and(pos, W - 1)
            else:
                col = lax.rem(pos, W)
            acc = jnp.zeros((L, Hid), jnp.float32)
            for kh in range(3):
                for kw in range(3):
                    tap = hid_ref[pl.ds(o0 + (kh + 1) * W + kw - 1, L), :]
                    tap = tap.astype(jnp.float32) * w9[kh * 3 + kw]
                    if kw == 0:
                        tap = jnp.where(col == 0, 0.0, tap)
                    elif kw == 2:
                        tap = jnp.where(col == W - 1, 0.0, tap)
                    acc = acc + tap
            project_store(acc, o0, L)

        _foreach_chunk(HW, chunk, dw_chunk)
    else:
        wo_idx = lax.broadcasted_iota(jnp.int32, (Wo, 1), 0)
        # TODO(synk): switch to lax.fori_loop over output rows for very large Ho
        # (224-class inputs) to keep compile time bounded.
        for ho in range(Ho):
            acc = jnp.zeros((Wo, Hid), jnp.float32)
            for kh in range(3):
                for kw in range(3):
                    start = (stride * ho + kh + 1) * W + kw - 1
                    tap = hid_ref[pl.ds(start, Wo, stride), :]
                    tap = tap.astype(jnp.float32) * w9[kh * 3 + kw]
                    if kw == 0:
                        tap = jnp.where(wo_idx == 0, 0.0, tap)
                    elif kw == 2 and stride * (Wo - 1) + kw - 1 >= W:
                        tap = jnp.where(wo_idx == Wo - 1, 0.0, tap)
                    acc = acc + tap
            project_store(acc, ho * Wo, Wo)


@functools.partial(jax.jit,
                   static_argnames=("stride", "use_res", "expand", "H", "W"))
def fused_block(x, w_exp, b_exp, w_dw, b_dw, w_proj, b_proj,
                *, stride, use_res, expand, H, W):
    """x:(N, H*W, Cin_p) bf16 -> (N, Ho*Wo, Cout_p) bf16, one launch per block."""
    N, HW, cin_p = x.shape
    assert HW == H * W
    hid_p = w_dw.shape[1]
    cout_p = w_proj.shape[1]
    if use_res:
        assert cin_p == cout_p
    Ho = (H - 1) // stride + 1
    Wo = (W - 1) // stride + 1

    ins = [x]
    in_specs = [pl.BlockSpec((1, HW, cin_p), lambda n: (n, 0, 0))]
    if expand:
        ins += [w_exp, b_exp]
        in_specs += [_full_spec(w_exp.shape), _full_spec(b_exp.shape)]
    ins += [w_dw, b_dw, w_proj, b_proj]
    in_specs += [_full_spec(w_dw.shape), _full_spec(b_dw.shape),
                 _full_spec(w_proj.shape), _full_spec(b_proj.shape)]

    kernel = functools.partial(_block_kernel, expand, use_res, stride, H, W)
    return pl.pallas_call(
        kernel,
        out_shape=jax.ShapeDtypeStruct((N, Ho * Wo, cout_p), jnp.bfloat16),
        grid=(N,),
        in_specs=in_specs,
        out_specs=pl.BlockSpec((1, Ho * Wo, cout_p), lambda n: (n, 0, 0)),
        scratch_shapes=[pltpu.VMEM(((H + 4) * W, hid_p), jnp.bfloat16)],
        compiler_params=pltpu.CompilerParams(
            dimension_semantics=("parallel",),
            vmem_limit_bytes=VMEM_LIMIT,
        ),
    )(*ins)


# ---------------- fused head conv + global-avg-pool + classifier ----------------

def _head_classifier_kernel(n_batch, inv_hw, x_ref, wh_ref, bh_ref,
                            w1_ref, b1_ref, w2_ref, b2_ref, o_ref):
    """relu6(x @ w_head + b) -> mean over spatial -> fc1+ReLU -> fc2.

    Dropout(0.2)/Dropout(0.1) are identity at inference.
    """
    for n in range(n_batch):
        h = jnp.dot(x_ref[n], wh_ref[...],
                    preferred_element_type=jnp.float32) + bh_ref[...]
        h = jnp.clip(h, 0.0, 6.0)                                    # (HW, 1280)
        pooled = jnp.sum(h, axis=0, keepdims=True) * inv_hw          # (1, 1280)
        h1 = jnp.dot(pooled.astype(jnp.bfloat16), w1_ref[...],
                     preferred_element_type=jnp.float32) + b1_ref[...]
        h1 = jnp.maximum(h1, 0.0)
        y = jnp.dot(h1.astype(jnp.bfloat16), w2_ref[...],
                    preferred_element_type=jnp.float32) + b2_ref[...]
        o_ref[pl.ds(n, 1), :] = y


@jax.jit
def head_classifier(x, wh, bh, w1, b1, w2, b2):
    """x:(N, H*W, Cin_p) bf16 -> logits (N, Npad) f32 in one launch."""
    N, HW, _ = x.shape
    Np = w2.shape[1]
    kernel = functools.partial(_head_classifier_kernel, N, 1.0 / HW)
    return pl.pallas_call(
        kernel,
        out_shape=jax.ShapeDtypeStruct((N, Np), jnp.float32),
        grid=(1,),
        in_specs=[_full_spec(x.shape), _full_spec(wh.shape), _full_spec(bh.shape),
                  _full_spec(w1.shape), _full_spec(b1.shape),
                  _full_spec(w2.shape), _full_spec(b2.shape)],
        out_specs=_full_spec((N, Np)),
        compiler_params=pltpu.CompilerParams(
            dimension_semantics=("arbitrary",),
            vmem_limit_bytes=VMEM_LIMIT,
        ),
    )(x, wh, bh, w1, b1, w2, b2)


# --------------------------- layout-only JAX glue ---------------------------

def im2col(x, ksize, stride, pad):
    """x:(N,H,W,C) -> (N*Ho*Wo, k*k*C), column ordering (kh, kw, c).  Only the
    3-channel stem uses this, so the 9x duplication is negligible."""
    N, H, W, C = x.shape
    xp = jnp.pad(x, ((0, 0), (pad, pad), (pad, pad), (0, 0)))
    Ho = (H + 2 * pad - ksize) // stride + 1
    Wo = (W + 2 * pad - ksize) // stride + 1
    taps = []
    for kh in range(ksize):
        for kw in range(ksize):
            sl = xp[:, kh:kh + (Ho - 1) * stride + 1:stride,
                    kw:kw + (Wo - 1) * stride + 1:stride, :]
            taps.append(sl.reshape(N * Ho * Wo, C))
    return jnp.concatenate(taps, axis=1), Ho, Wo


def fold_bn(p):
    scale = p["gamma"] / jnp.sqrt(p["var"] + BN_EPS)
    bias = p["beta"] - p["mean"] * scale
    return scale.reshape(1, -1), bias.reshape(1, -1)


# ---------------------- parameters (deterministic init) ----------------------

INVERTED_RESIDUAL_SETTING = [
    # t, c, n, s  (torchvision MobileNetV2, width_mult=1.0)
    (1, 16, 1, 1),
    (6, 24, 2, 2),
    (6, 32, 3, 2),
    (6, 64, 4, 2),
    (6, 96, 3, 1),
    (6, 160, 3, 2),
    (6, 320, 1, 1),
]
LAST_CHANNEL = 1280


class ParamGen:
    def __init__(self, key):
        self._key = key
        self._n = 0

    def draw(self, shape, scale=0.05):
        self._n += 1
        k = jax.random.fold_in(self._key, self._n)
        return scale * jax.random.normal(k, shape, dtype=jnp.float32)


def make_conv_bn(pg, w_shape):
    cout = w_shape[0]
    return dict(
        w=pg.draw(w_shape),                         # PyTorch (Cout, Cin/groups, kH, kW)
        gamma=1.0 + pg.draw((cout,), 0.1),
        beta=pg.draw((cout,), 0.1),
        mean=pg.draw((cout,), 0.1),
        var=1.0 + jnp.abs(pg.draw((cout,), 0.1)),
    )


def build_params(key, num_classes=1):
    pg = ParamGen(key)
    params = {"stem": make_conv_bn(pg, (32, 3, 3, 3))}
    blocks = []
    cin = 32
    for t, c, n, s in INVERTED_RESIDUAL_SETTING:
        for i in range(n):
            stride = s if i == 0 else 1
            hidden = cin * t
            blk = {"stride": stride, "use_res": stride == 1 and cin == c,
                   "expand": t != 1}
            if t != 1:
                blk["pw_expand"] = make_conv_bn(pg, (hidden, cin, 1, 1))
            blk["dw"] = make_conv_bn(pg, (hidden, 1, 3, 3))
            blk["pw_project"] = make_conv_bn(pg, (c, hidden, 1, 1))
            blocks.append(blk)
            cin = c
    params["blocks"] = blocks
    params["head"] = make_conv_bn(pg, (LAST_CHANNEL, cin, 1, 1))
    params["fc1_w"] = pg.draw((512, LAST_CHANNEL))   # PyTorch Linear layout (out, in)
    params["fc1_b"] = pg.draw((512,))
    params["fc2_w"] = pg.draw((num_classes, 512))
    params["fc2_b"] = pg.draw((num_classes,))
    return params


def prepare_params(raw, num_classes=1):
    """One-time offline conversion: fold BN scale into weights, transpose to
    matmul layout, zero-pad channel dims to multiples of 128 (lane-dense) and
    cast MXU weights to bf16.  Zero padding carries exact zeros end-to-end."""
    prep = {"num_classes": num_classes}

    p = raw["stem"]
    scale, bias = fold_bn(p)
    cout = p["w"].shape[0]
    cp = round_up(cout, LANE)
    w2d = jnp.transpose(p["w"], (2, 3, 1, 0)).reshape(-1, cout) * scale
    prep["stem_w"] = pad_axis(w2d, 1, cp).astype(jnp.bfloat16)
    prep["stem_b"] = pad_axis(bias, 1, cp)

    blocks = []
    cin, cin_p = cout, cp
    for blk in raw["blocks"]:
        b = {"stride": blk["stride"], "use_res": blk["use_res"],
             "expand": blk["expand"]}
        if blk["expand"]:
            p = blk["pw_expand"]
            hidden = p["w"].shape[0]
            hp = round_up(hidden, LANE)
            scale, bias = fold_bn(p)
            w2d = p["w"].reshape(hidden, cin).T * scale
            b["w_exp"] = pad_axis(pad_axis(w2d, 0, cin_p), 1, hp).astype(jnp.bfloat16)
            b["b_exp"] = pad_axis(bias, 1, hp)
        else:
            hidden, hp = cin, cin_p
        p = blk["dw"]
        scale, bias = fold_bn(p)
        w9 = p["w"].reshape(hidden, 9).T * scale       # (9, hidden), rows = kh*3+kw
        b["w_dw"] = pad_axis(w9, 1, hp)                # f32, used on the VPU
        b["b_dw"] = pad_axis(bias, 1, hp)
        p = blk["pw_project"]
        cout = p["w"].shape[0]
        cp = round_up(cout, LANE)
        scale, bias = fold_bn(p)
        w2d = p["w"].reshape(cout, hidden).T * scale
        b["w_proj"] = pad_axis(pad_axis(w2d, 0, hp), 1, cp).astype(jnp.bfloat16)
        b["b_proj"] = pad_axis(bias, 1, cp)
        blocks.append(b)
        cin, cin_p = cout, cp
    prep["blocks"] = blocks

    p = raw["head"]
    scale, bias = fold_bn(p)
    w2d = p["w"].reshape(LAST_CHANNEL, cin).T * scale
    prep["head_w"] = pad_axis(w2d, 0, cin_p).astype(jnp.bfloat16)
    prep["head_b"] = bias                              # (1, 1280), lane-dense

    prep["fc1_w"] = raw["fc1_w"].T.astype(jnp.bfloat16)          # (1280, 512)
    prep["fc1_b"] = raw["fc1_b"].reshape(1, -1)
    ncp = round_up(num_classes, LANE)
    prep["fc2_w"] = pad_axis(raw["fc2_w"].T, 1, ncp).astype(jnp.bfloat16)
    prep["fc2_b"] = pad_axis(raw["fc2_b"].reshape(1, -1), 1, ncp)
    return prep


# -------------------------------- forward pass --------------------------------

def simple_deepfake_detector_forward(prep, x_nchw):
    # MobileNetV2.forward: features -> adaptive_avg_pool2d((1,1)) -> flatten(1)
    # -> classifier = [Dropout(0.2), Linear(1280,512), ReLU, Dropout(0.1), Linear(512,1)]
    x = jnp.transpose(x_nchw, (0, 2, 3, 1)).astype(jnp.float32)   # NCHW -> NHWC
    N = x.shape[0]

    cols, H, W = im2col(x, 3, 2, 1)                    # stem 3x3 stride-2 conv
    y = matmul_bias_act(cols, prep["stem_w"], prep["stem_b"], act="relu6")
    x = y.reshape(N, H * W, prep["stem_w"].shape[1])   # (N, HW, Cp) lane-dense

    for blk in prep["blocks"]:
        x = fused_block(
            x, blk.get("w_exp"), blk.get("b_exp"),
            blk["w_dw"], blk["b_dw"], blk["w_proj"], blk["b_proj"],
            stride=blk["stride"], use_res=blk["use_res"], expand=blk["expand"],
            H=H, W=W)
        if blk["stride"] == 2:
            H = (H - 1) // 2 + 1
            W = (W - 1) // 2 + 1

    logits = head_classifier(x, prep["head_w"], prep["head_b"],
                             prep["fc1_w"], prep["fc1_b"],
                             prep["fc2_w"], prep["fc2_b"])
    # TODO(synk): train-mode Dropout RNG masking is not implemented (inference only).
    return logits[:, :prep["num_classes"]]


if __name__ == "__main__":
    key = jax.random.PRNGKey(0)
    raw_params = build_params(jax.random.fold_in(key, 1), num_classes=1)
    prep = prepare_params(raw_params, num_classes=1)
    # Small NCHW RGB input consistent with the module (32x32 is the minimum
    # spatial size that survives MobileNetV2's five stride-2 stages).
    x = jax.random.normal(jax.random.fold_in(key, 2), (2, 3, 32, 32), dtype=jnp.float32)
    logits = simple_deepfake_detector_forward(prep, x)
    logits = jax.block_until_ready(logits)
    assert logits.shape == (2, 1) and logits.dtype == jnp.float32
    assert bool(jnp.all(jnp.isfinite(logits)))
    print("KERNEL_OK")
</pallas_src>

<mosaic_0001>
module attributes {stable_mosaic.version = 11 : i64} {
  func.func @_mm_bias_act_kernel(%arg0: i32, %arg1: i32, %arg2: memref<256x27xbf16, #tpu.memory_space<vmem>>, %arg3: memref<27x128xbf16, #tpu.memory_space<vmem>>, %arg4: memref<1x128xf32, #tpu.memory_space<vmem>>, %arg5: memref<256x128xbf16, #tpu.memory_space<vmem>>) attributes {dimension_semantics = [#tpu.dimension_semantics<parallel>, #tpu.dimension_semantics<parallel>], iteration_bounds = array<i64: 2, 1>, scalar_prefetch = 0 : i64, scratch_operands = 0 : i64, tpu.core_type = #tpu.core_type<tc>, window_params = [{transform_indices = @transform_0, window_bounds = array<i64: 256, 27>}, {transform_indices = @transform_1, window_bounds = array<i64: 27, 128>}, {transform_indices = @transform_2, window_bounds = array<i64: 1, 128>}, {transform_indices = @transform_3, window_bounds = array<i64: 256, 128>}]} {
    %c0 = arith.constant 0 : index
    %c0_0 = arith.constant 0 : index
    %0 = vector.load %arg2[%c0, %c0_0] : memref<256x27xbf16, #tpu.memory_space<vmem>>, vector<256x27xbf16>
    %c0_1 = arith.constant 0 : index
    %c0_2 = arith.constant 0 : index
    %1 = vector.load %arg3[%c0_1, %c0_2] : memref<27x128xbf16, #tpu.memory_space<vmem>>, vector<27x128xbf16>
    %cst = arith.constant dense<0.000000e+00> : vector<256x128xf32>
    %2 = tpu.matmul %0, %1, %cst {dimension_numbers = #tpu.dot_dimension_numbers<[1], [0], [0], [1], [0, 0, 1, 1], [], []>} : vector<256x27xbf16>, vector<27x128xbf16>, vector<256x128xf32> -> vector<256x128xf32>
    %c0_3 = arith.constant 0 : index
    %c0_4 = arith.constant 0 : index
    %3 = vector.load %arg4[%c0_3, %c0_4] : memref<1x128xf32, #tpu.memory_space<vmem>>, vector<1x128xf32>
    %4 = vector.broadcast %3 : vector<1x128xf32> to vector<256x128xf32>
    %5 = arith.addf %2, %4 : vector<256x128xf32>
    %cst_5 = arith.constant 0.000000e+00 : f32
    %cst_6 = arith.constant 6.000000e+00 : f32
    %6 = vector.broadcast %cst_5 : f32 to vector<256x128xf32>
    %7 = arith.maximumf %6, %5 : vector<256x128xf32>
    %8 = vector.broadcast %cst_6 : f32 to vector<256x128xf32>
    %9 = arith.minimumf %8, %7 : vector<256x128xf32>
    %10 = arith.truncf %9 : vector<256x128xf32> to vector<256x128xbf16>
    %c0_7 = arith.constant 0 : index
    %c0_8 = arith.constant 0 : index
    %11 = vector.load %arg5[%c0_7, %c0_8] : memref<256x128xbf16, #tpu.memory_space<vmem>>, vector<256x128xbf16>
    tpu.vector_store %arg5[%c0_7, %c0_8], %10 {strides = array<i32>} : memref<256x128xbf16, #tpu.memory_space<vmem>>, vector<256x128xbf16>,
    return
  }
  func.func @transform_0(%arg0: i32, %arg1: i32) -> (i32, i32) {
    %c0_i32 = arith.constant 0 : i32
    %c0_i32_0 = arith.constant 0 : i32
    return %arg0, %c0_i32 : i32, i32
  }
  func.func @transform_1(%arg0: i32, %arg1: i32) -> (i32, i32) {
    %c0_i32 = arith.constant 0 : i32
    %c0_i32_0 = arith.constant 0 : i32
    return %c0_i32, %arg1 : i32, i32
  }
  func.func @transform_2(%arg0: i32, %arg1: i32) -> (i32, i32) {
    %c0_i32 = arith.constant 0 : i32
    %c0_i32_0 = arith.constant 0 : i32
    return %c0_i32, %arg1 : i32, i32
  }
  func.func @transform_3(%arg0: i32, %arg1: i32) -> (i32, i32) {
    %c0_i32 = arith.constant 0 : i32
    return %arg0, %arg1 : i32, i32
  }
}

</mosaic_0001>

<bundles_post_ra>
// kernel: matmul_bias_act.1
= control target key start
LH: loop header
LB: loop body
LE: loop exit
PB: predicated region body
PF: predicated region fallthrough
CT: control target
= control target key end

     0   :  { %8 = vsyncpa [#allocation3], 0  ;;  %s1569_s0 = inlined_call_operand.vmem [shape: bf16[512,27], index: 0, kind: input, shape index: {}]   ;;  %s1570_s1 = inlined_call_operand.vmem [shape: bf16[27,128], index: 1, kind: input, shape index: {}]   ;;  %s1571_s2 = inlined_call_operand.vmem [shape: f32[1,128], index: 2, kind: input, shape index: {}]   ;;  %s1572_s3 = inlined_call_operand.hbm [shape: bf16[512,128], index: 3, kind: output, shape index: {}]  }
   0x1   :  { %10 = vsyncpa [#allocation3 + $0x1], 0  ;;  %s1355_s12 = smov 0   ;;  %s1357_s13 = smov 0  }
   0x2   :  { %s1359_s14 = smov 0   ;;  %s1361_s15 = smov 0  }
   0x3   :  { %s1363_s16 = smov 0   ;;  %s1365_s17 = smov 0  }
   0x4 LB: > { %s907_s18 = sadd.s32 4294967295, %s1329_s17   ;;  %s908_s19 = sadd.s32 4294967294, %s1329_s17   ;;  %s1329_s17 = sphi %s1365_s17, %s16_s17   ;;  %s1325_s16 = sphi %s1363_s16, %s1579_s16   ;;  %s1321_s15 = sphi %s1361_s15, %s1578_s15   ;;  %s1317_s14 = sphi %s1359_s14, %s1577_s14   ;;  %s1313_s13 = sphi %s1357_s13, %s1576_s13   ;;  %s1309_s12 = sphi %s1355_s12, %s1575_s12  }
   0x5   : > { %s28_s20 = sadd.s32 1, %s1325_s16  ;;  %s115_s21 = sadd.s32 1, %s1317_s14 }
   0x6   : > { %p30_p0 = scmp.ge.s32.totalorder %s28_s20, 2  ;;  %p125_p1 = scmp.ne.s32.totalorder %s1317_s14, %s1313_s13 }
   0x7   : > { %p126_p2 = scmp.eq.s32.totalorder %s907_s18, 1  ;;  %p131_p3 = scmp.ne.s32.totalorder %s1313_s13, %s1309_s12 }
   0x8   : > { %s1581_s20 = smov (%p30_p0, %s28_s20), 0  ;;  %p132_p5 = scmp.eq.s32.totalorder %s908_s19, 1 }
   0x9   : > { %p1395_p4 = por %p126_p2, %p125_p1  ;;  %s110_s23 = ssub.s32 %s1325_s16, %s1581_s20 }
   0xa   : > { %p913_p6 = scmp.ge.s32.totalorder %s1329_s17, 1  ;;  %p113_p7 = scmp.eq.s32.totalorder %s110_s23, 0 }
   0xb   : > { %p1402_p8 = por %p132_p5, %p131_p3  ;;  %p172_p9 = scmp.lt.s32.totalorder %s1329_s17, 3 }
   0xc   : > { %s1408_s25 = scalar_select %p113_p7, %s1317_s14, %s115_s21  }
   0xd   : > { %p173_p10 = pnand %p913_p6, %p172_p9 }
   0xe   : > { %v1233_v0 = vld [vmem:[%s1570_s1] sm:$0xff] (!%p173_p10)   ;;  %vm401_vm0 = vcmask (!%p173_p10), 1044480   ;;  %v1234_v1 = vld [vmem:[%s1570_s1 + $0x8] sm:$0x3f] (!%p173_p10)   ;;  %vm402_vm1 = vcmask (!%p173_p10), 1045504   ;;  %s915_s30 = sshll.u32 (!%p173_p10), %s1321_s15, 5 }
   0xf   : > { %176 = sbr.rel (%p173_p10) target bundleno = 290 (0x122), region = 32  ;;  %1135 = vmatprep.subr.bf16.mxu0 (!%p173_p10), %v1233_v0  ;;  %1171 = vmatprep.subr.bf16.mxu1 (!%p173_p10), %v1233_v0  ;;  %v1331_v2 = vmov (!%p173_p10), 65535   ;;  %p204_p11 = scmp.lt.s32.totalorder (!%p173_p10), %s915_s30, 63  ;;  %vm352_vm2 = vcmask (!%p173_p10), 220160   ;;  %v1457_v22 = vld [vmem:[%s1571_s2] ss:$0 sm:$0xff] (!%p173_p10) }
  0x10   : > { %1136 = vmatpush3.bf16.msra.mxu0 (!%p173_p10), %v1233_v0  ;;  %1173 = vmatpush3.bf16.msra.mxu1 (!%p173_p10), %v1233_v0  ;;  %v403_v3 = vsel (!%p173_p10), %vm401_vm0, 4294967295, %v1331_v2  ;;  %s200_s10 = sand.u32 (!%p173_p10), 1, %s1313_s13   ;;  %s1021_s19 = sshll.u32 (!%p173_p10), %s1321_s15, 11 }
  0x11   : > { %v404_v4 = vsel (!%p173_p10), %vm402_vm1, %v403_v3, 0  ;;  %s914_s11 = sshll.u32 (!%p173_p10), %s200_s10, 7  ;;  %s1513_s27 = scalar_lea.hbm (!%p173_p10), %s1572_s3, %s1021_s19 }
  0x12   : > { %v406_v5 = vand.u32 (!%p173_p10), %v1234_v1, %v404_v4  ;;  %s1473_s18 = scalar_lea.vmem (!%p173_p10), [#allocation2], %s914_s11  ;;  %s1523_s15 = scalar_lea.sflag (!%p173_p10), [#allocation3], %s200_s10 }
  0x13   : > { %s808_s21 = sshll.u32 (!%p173_p10), %s1473_s18, 4  ;;  %s1332_s29 = smov (!%p173_p10), [#allocation2]   ;;  %s1515_s21 = int_to_ptr.vmem [resolvable:$true] %s808_s21 }
  0x14   : > { %1137 = vmatprep.subr.bf16.mxu0 (!%p173_p10), %v406_v5  ;;  %1172 = vmatprep.subr.bf16.mxu1 (!%p173_p10), %v406_v5  ;;  %s1251_s28 = scalar_lea.vmem (!%p173_p10), %s1515_s21, 2048 }
  0x15   : > { %1138 = vmatpush3.bf16.msra.mxu0 (!%p173_p10), %v406_v5  ;;  %1174 = vmatpush3.bf16.msra.mxu1 (!%p173_p10), %v406_v5  ;;  %p1252_p12 = scmp.ne.s32.totalorder (!%p173_p10), %s1515_s21, %s1251_s28 }
  0x16   : > { %s1583_s30 = smov (!%p204_p11, %s915_s30), 63 }
  0x17   : > { %s916_s4 = sshll.u32 %s1583_s30, 2  ;;  %p1253_p13 = pnand %p1252_p12, %p1395_p4 }
  0x18   : > { %s1420_s7 = scalar_lea.vmem %s1569_s0, %s916_s4  ;;  %s1255_s30 = sshll.u32 %s1332_s29, 4  ;;  %s1256_s30 = int_to_ptr.vmem [resolvable:$false] %s1255_s30 }
  0x19   : > { %v1235_v6 = vld [vmem:[%s1420_s7] sm:$0xff]   ;;  %v1237_v8 = vld [vmem:[%s1420_s7 + $0x8] sm:$0xff]   ;;  %v1239_v10 = vld [vmem:[%s1420_s7 + $0x10] sm:$0xff]   ;;  %p1254_p0 = pneg %p1253_p13  ;;  %s1257_s4 = scalar_lea.vmem %s1256_s30, 4096 }
  0x1a   : > { %v1236_v7 = vld [vmem:[%s1420_s7 + $0x40] sm:$0xff]   ;;  %1139 = vmatprep.mubr.msk.bf16.mxu0 %vm352_vm2, %v1235_v6  ;;  %v1238_v9 = vld [vmem:[%s1420_s7 + $0x48] sm:$0xff]   ;;  %v1240_v11 = vld [vmem:[%s1420_s7 + $0x50] sm:$0xff]   ;;  %p1258_p1 = scmp.lt.s32.totalorder %s1515_s21, %s1256_s30  ;;  %p1259_p2 = scmp.lt.s32.totalorder %s1257_s4, %s1251_s28 }
  0x1b   : > { %1155 = vmatprep.mubr.msk.bf16.mxu1 %vm352_vm2, %v1236_v7  ;;  %1140 = vmatmul.mubr.msk.bf16.vlgmr.msra.gmra.mrb[0].mxu0 %vm352_vm2, %v1237_v8  ;;  %v1241_v12 = vld [vmem:[%s1420_s7 + $0x18] sm:$0xff]   ;;  %v1243_v14 = vld [vmem:[%s1420_s7 + $0x20] sm:$0xff]   ;;  %v1245_v16 = vld [vmem:[%s1420_s7 + $0x28] sm:$0xff]  }
  0x1c   : > { %1156 = vmatmul.mubr.msk.bf16.vlgmr.msra.gmra.mrb[0].mxu1 %vm352_vm2, %v1238_v9  ;;  %1143 = vmatprep.mubr.msk.bf16.mxu0 %vm352_vm2, %v1239_v10  ;;  %v1242_v13 = vld [vmem:[%s1420_s7 + $0x58] sm:$0xff]   ;;  %v1244_v15 = vld [vmem:[%s1420_s7 + $0x60] sm:$0xff]   ;;  %v1246_v17 = vld [vmem:[%s1420_s7 + $0x68] sm:$0xff]   ;;  %p1260_p3 = por %p1259_p2, %p1258_p1 }
  0x1d   : > { %1159 = vmatprep.mubr.msk.bf16.mxu1 %vm352_vm2, %v1240_v11  ;;  %v1247_v18 = vld [vmem:[%s1420_s7 + $0x30] sm:$0xff]   ;;  %v1249_v20 = vld [vmem:[%s1420_s7 + $0x38] sm:$0xff]  }
  0x1e   : > { %v1248_v19 = vld [vmem:[%s1420_s7 + $0x70] sm:$0xff]   ;;  %v1250_v21 = vld [vmem:[%s1420_s7 + $0x78] sm:$0xff]   ;;  %p1261_p5 = pnand %p1260_p3, %p1254_p0 }
  0x23   : > { %1144 = vmatmul.mubr.msk.bf16.gmra.mrb[4].mxu0 %vm352_vm2, %v1241_v12 }
  0x24   : > { %1160 = vmatmul.mubr.msk.bf16.gmra.mrb[4].mxu1 %vm352_vm2, %v1242_v13  ;;  %1147 = vmatprep.mubr.msk.bf16.mxu0 %vm352_vm2, %v1243_v14 }
  0x25   : > { %1163 = vmatprep.mubr.msk.bf16.mxu1 %vm352_vm2, %v1244_v15 }
  0x2b   : > { %1148 = vmatmul.mubr.msk.bf16.gmra.mrb[8].mxu0 %vm352_vm2, %v1245_v16 }
  0x2c   : > { %1164 = vmatmul.mubr.msk.bf16.gmra.mrb[8].mxu1 %vm352_vm2, %v1246_v17  ;;  %1151 = vmatprep.mubr.msk.bf16.mxu0 %vm352_vm2, %v1247_v18 }
  0x2d   : > { %1167 = vmatprep.mubr.msk.bf16.mxu1 %vm352_vm2, %v1248_v19 }
  0x33   : > { %1152 = vmatmul.mubr.msk.bf16.gmra.mrb[12].mxu0 %vm352_vm2, %v1249_v20 }
  0x34   : > { %1168 = vmatmul.mubr.msk.bf16.gmra.mrb[12].mxu1 %vm352_vm2, %v1250_v21 }
  0xee   : > { %v1141_v23 = vpop.f32.mrb[0].mxu0 }
  0xef   : > { %v451_v24 = vadd.f32 %v1141_v23, %v1457_v22  ;;  %v1157_v25 = vpop.f32.mrb[0].mxu1  ;;  %v442_v26 = vpop.f32.mrb[1].mxu0 }
  0xf0   : > { %v515_v27 = vadd.f32 %v1157_v25, %v1457_v22  ;;  %v443_v28 = vadd.f32 %v1457_v22, %v442_v26  ;;  %v506_v29 = vpop.f32.mrb[1].mxu1  ;;  %v1142_v30 = vpop.f32.mrb[2].mxu0 }
  0xf1   : > { %v571_v31 = vmax.f32 %v451_v24, 0.0  ;;  %v507_v32 = vadd.f32 %v1457_v22, %v506_v29  ;;  %v454_v33 = vadd.f32 %v1142_v30, %v1457_v22  ;;  %v1158_v34 = vpop.f32.mrb[2].mxu1  ;;  %v445_v35 = vpop.f32.mrb[3].mxu0 }
  0xf2   : > { %v587_v36 = vmax.f32 %v515_v27, 0.0  ;;  %v569_v37 = vmax.f32 %v443_v28, 0.0  ;;  %v518_v38 = vadd.f32 %v1158_v34, %v1457_v22  ;;  %v446_v39 = vadd.f32 %v1457_v22, %v445_v35  ;;  %v509_v40 = vpop.f32.mrb[3].mxu1 }
  0xf3   : > { %v585_v41 = vmax.f32 %v507_v32, 0.0  ;;  %v572_v42 = vmax.f32 %v454_v33, 0.0  ;;  %v510_v43 = vadd.f32 %v1457_v22, %v509_v40  ;;  %v603_v46 = vmin.f32 %v571_v31, 6.0 }
  0xf4   : > { %v588_v44 = vmax.f32 %v518_v38, 0.0  ;;  %v570_v45 = vmax.f32 %v446_v39, 0.0  ;;  %v619_v49 = vmin.f32 %v587_v36, 6.0  ;;  %v601_v50 = vmin.f32 %v569_v37, 6.0 }
  0xf5   : > { %v604_v47 = vmin.f32 %v572_v42, 6.0  ;;  %v586_v48 = vmax.f32 %v510_v43, 0.0  ;;  %v617_v54 = vmin.f32 %v585_v41, 6.0 }
  0xf6   : > { %v620_v51 = vmin.f32 %v588_v44, 6.0  ;;  %v602_v52 = vmin.f32 %v570_v45, 6.0  ;;  %v1145_v53 = vpop.f32.mrb[4].mxu0 }
  0xf7   : > { %v1030_v55 = vpack.c.bf16 %v604_v47, %v603_v46  ;;  %v618_v56 = vmin.f32 %v586_v48, 6.0  ;;  %v467_v57 = vadd.f32 %v1145_v53, %v1457_v22  ;;  %v1161_v58 = vpop.f32.mrb[4].mxu1  ;;  %v458_v59 = vpop.f32.mrb[5].mxu0 }
  0xf8   : > { %v1070_v60 = vpack.c.bf16 %v620_v51, %v619_v49  ;;  %v1025_v61 = vpack.c.bf16 %v602_v52, %v601_v50  ;;  %v531_v62 = vadd.f32 %v1161_v58, %v1457_v22  ;;  %v459_v63 = vadd.f32 %v1457_v22, %v458_v59  ;;  %v522_v0 = vpop.f32.mrb[5].mxu1  ;;  %v1146_v1 = vpop.f32.mrb[6].mxu0 }
  0xf9   : > { %1102 = vst [vmem:[%s1473_s18 + $0x8] sm:$0xff] %v1030_v55   ;;  %v1065_v2 = vpack.c.bf16 %v618_v56, %v617_v54  ;;  %v575_v3 = vmax.f32 %v467_v57, 0.0  ;;  %v523_v4 = vadd.f32 %v1457_v22, %v522_v0  ;;  %v470_v5 = vadd.f32 %v1146_v1, %v1457_v22  ;;  %v1162_v6 = vpop.f32.mrb[6].mxu1  ;;  %v461_v7 = vpop.f32.mrb[7].mxu0 }
  0xfa   : > { %1110 = vst [vmem:[%s1473_s18 + $0x48] sm:$0xff] %v1070_v60   ;;  %1026 = vst [vmem:[%s1473_s18] sm:$0xff] %v1025_v61   ;;  %v591_v8 = vmax.f32 %v531_v62, 0.0  ;;  %v573_v9 = vmax.f32 %v459_v63, 0.0  ;;  %v534_v10 = vadd.f32 %v1162_v6, %v1457_v22  ;;  %v462_v11 = vadd.f32 %v1457_v22, %v461_v7  ;;  %v525_v12 = vpop.f32.mrb[7].mxu1 }
  0xfb   : > { %1109 = vst [vmem:[%s1473_s18 + $0x40] sm:$0xff] %v1065_v2   ;;  %v589_v13 = vmax.f32 %v523_v4, 0.0  ;;  %v576_v14 = vmax.f32 %v470_v5, 0.0  ;;  %v526_v15 = vadd.f32 %v1457_v22, %v525_v12  ;;  %v607_v18 = vmin.f32 %v575_v3, 6.0 }
  0xfc   : > { %v592_v16 = vmax.f32 %v534_v10, 0.0  ;;  %v574_v17 = vmax.f32 %v462_v11, 0.0  ;;  %v623_v21 = vmin.f32 %v591_v8, 6.0  ;;  %v605_v23 = vmin.f32 %v573_v9, 6.0 }
  0xfd   : > { %v608_v19 = vmin.f32 %v576_v14, 6.0  ;;  %v590_v20 = vmax.f32 %v526_v15, 0.0  ;;  %v621_v27 = vmin.f32 %v589_v13, 6.0 }
  0xfe   : > { %v624_v24 = vmin.f32 %v592_v16, 6.0  ;;  %v606_v25 = vmin.f32 %v574_v17, 6.0  ;;  %v1149_v26 = vpop.f32.mrb[8].mxu0 }
  0xff   : > { %v1040_v28 = vpack.c.bf16 %v608_v19, %v607_v18  ;;  %v622_v29 = vmin.f32 %v590_v20, 6.0  ;;  %v483_v30 = vadd.f32 %v1149_v26, %v1457_v22  ;;  %v1165_v31 = vpop.f32.mrb[8].mxu1  ;;  %v474_v32 = vpop.f32.mrb[9].mxu0 }
 0x100   : > { %v1080_v33 = vpack.c.bf16 %v624_v24, %v623_v21  ;;  %v1035_v34 = vpack.c.bf16 %v606_v25, %v605_v23  ;;  %v547_v35 = vadd.f32 %v1165_v31, %v1457_v22  ;;  %v475_v36 = vadd.f32 %v1457_v22, %v474_v32  ;;  %v538_v37 = vpop.f32.mrb[9].mxu1  ;;  %v1150_v38 = vpop.f32.mrb[10].mxu0 }
 0x101   : > { %1104 = vst [vmem:[%s1473_s18 + $0x18] sm:$0xff] %v1040_v28   ;;  %v1075_v39 = vpack.c.bf16 %v622_v29, %v621_v27  ;;  %v579_v40 = vmax.f32 %v483_v30, 0.0  ;;  %v539_v41 = vadd.f32 %v1457_v22, %v538_v37  ;;  %v486_v42 = vadd.f32 %v1150_v38, %v1457_v22  ;;  %v1166_v43 = vpop.f32.mrb[10].mxu1  ;;  %v477_v44 = vpop.f32.mrb[11].mxu0 }
 0x102   : > { %1112 = vst [vmem:[%s1473_s18 + $0x58] sm:$0xff] %v1080_v33   ;;  %1103 = vst [vmem:[%s1473_s18 + $0x10] sm:$0xff] %v1035_v34   ;;  %v595_v45 = vmax.f32 %v547_v35, 0.0  ;;  %v577_v46 = vmax.f32 %v475_v36, 0.0  ;;  %v550_v47 = vadd.f32 %v1166_v43, %v1457_v22  ;;  %v478_v48 = vadd.f32 %v1457_v22, %v477_v44  ;;  %v541_v49 = vpop.f32.mrb[11].mxu1 }
 0x103   : > { %1111 = vst [vmem:[%s1473_s18 + $0x50] sm:$0xff] %v1075_v39   ;;  %v593_v50 = vmax.f32 %v539_v41, 0.0  ;;  %v580_v51 = vmax.f32 %v486_v42, 0.0  ;;  %v542_v52 = vadd.f32 %v1457_v22, %v541_v49  ;;  %v611_v55 = vmin.f32 %v579_v40, 6.0 }
 0x104   : > { %v596_v53 = vmax.f32 %v550_v47, 0.0  ;;  %v578_v54 = vmax.f32 %v478_v48, 0.0  ;;  %v627_v58 = vmin.f32 %v595_v45, 6.0  ;;  %v609_v59 = vmin.f32 %v577_v46, 6.0 }
 0x105   : > { %v612_v56 = vmin.f32 %v580_v51, 6.0  ;;  %v594_v57 = vmax.f32 %v542_v52, 0.0  ;;  %v625_v63 = vmin.f32 %v593_v50, 6.0 }
 0x106   : > { %v628_v60 = vmin.f32 %v596_v53, 6.0  ;;  %v610_v61 = vmin.f32 %v578_v54, 6.0  ;;  %v1153_v62 = vpop.f32.mrb[12].mxu0 }
 0x107   : > { %v1050_v0 = vpack.c.bf16 %v612_v56, %v611_v55  ;;  %v626_v1 = vmin.f32 %v594_v57, 6.0  ;;  %v499_v2 = vadd.f32 %v1153_v62, %v1457_v22  ;;  %v1169_v3 = vpop.f32.mrb[12].mxu1  ;;  %v490_v4 = vpop.f32.mrb[13].mxu0 }
 0x108   : > { %v1090_v5 = vpack.c.bf16 %v628_v60, %v627_v58  ;;  %v1045_v6 = vpack.c.bf16 %v610_v61, %v609_v59  ;;  %v563_v7 = vadd.f32 %v1169_v3, %v1457_v22  ;;  %v491_v8 = vadd.f32 %v1457_v22, %v490_v4  ;;  %v554_v9 = vpop.f32.mrb[13].mxu1  ;;  %v1154_v10 = vpop.f32.mrb[14].mxu0 }
 0x109   : > { %1106 = vst [vmem:[%s1473_s18 + $0x28] sm:$0xff] %v1050_v0   ;;  %v1085_v11 = vpack.c.bf16 %v626_v1, %v625_v63  ;;  %v583_v12 = vmax.f32 %v499_v2, 0.0  ;;  %v555_v13 = vadd.f32 %v1457_v22, %v554_v9  ;;  %v502_v14 = vadd.f32 %v1154_v10, %v1457_v22  ;;  %v1170_v15 = vpop.f32.mrb[14].mxu1  ;;  %v493_v16 = vpop.f32.mrb[15].mxu0 }
 0x10a   : > { %1114 = vst [vmem:[%s1473_s18 + $0x68] sm:$0xff] %v1090_v5   ;;  %1105 = vst [vmem:[%s1473_s18 + $0x20] sm:$0xff] %v1045_v6   ;;  %v599_v17 = vmax.f32 %v563_v7, 0.0  ;;  %v581_v18 = vmax.f32 %v491_v8, 0.0  ;;  %v566_v19 = vadd.f32 %v1170_v15, %v1457_v22  ;;  %v494_v20 = vadd.f32 %v1457_v22, %v493_v16  ;;  %v557_v21 = vpop.f32.mrb[15].mxu1 }
 0x10b   : > { %1113 = vst [vmem:[%s1473_s18 + $0x60] sm:$0xff] %v1085_v11   ;;  %v597_v23 = vmax.f32 %v555_v13, 0.0  ;;  %v584_v24 = vmax.f32 %v502_v14, 0.0  ;;  %v558_v25 = vadd.f32 %v1457_v22, %v557_v21  ;;  %v615_v28 = vmin.f32 %v583_v12, 6.0 }
 0x10c   : > { %v600_v26 = vmax.f32 %v566_v19, 0.0  ;;  %v582_v27 = vmax.f32 %v494_v20, 0.0  ;;  %v631_v31 = vmin.f32 %v599_v17, 6.0  ;;  %v613_v32 = vmin.f32 %v581_v18, 6.0 }
 0x10d   : > { %v616_v29 = vmin.f32 %v584_v24, 6.0  ;;  %v598_v30 = vmax.f32 %v558_v25, 0.0  ;;  %v629_v35 = vmin.f32 %v597_v23, 6.0 }
 0x10e   : > { %v632_v33 = vmin.f32 %v600_v26, 6.0  ;;  %v614_v34 = vmin.f32 %v582_v27, 6.0 }
 0x10f   : > { %v1060_v36 = vpack.c.bf16 %v616_v29, %v615_v28  ;;  %v630_v22 = vmin.f32 %v598_v30, 6.0 }
 0x110   : > { %v1100_v37 = vpack.c.bf16 %v632_v33, %v631_v31  ;;  %v1055_v38 = vpack.c.bf16 %v614_v34, %v613_v32 }
 0x111   : > { %1108 = vst [vmem:[%s1473_s18 + $0x38] sm:$0xff] %v1060_v36   ;;  %v1095_v39 = vpack.c.bf16 %v630_v22, %v629_v35 }
 0x112   : > { %1116 = vst [vmem:[%s1473_s18 + $0x78] sm:$0xff] %v1100_v37   ;;  %1107 = vst [vmem:[%s1473_s18 + $0x30] sm:$0xff] %v1055_v38  }
 0x113   : > { %1115 = vst [vmem:[%s1473_s18 + $0x70] sm:$0xff] %v1095_v39  }
 0x114   : > { %1264 = shalt.err (!%p1261_p5)
}
 0x115   : > { %s1265_s5 = scalar_lea.hbm %s1513_s27, 2048  ;;  %s1269_s8 = scalar_lea.hbm %s1572_s3, 4096 }
 0x116   : > { %p1266_p6 = scmp.ne.s32.totalorder %s1513_s27, %s1265_s5  ;;  %p1270_p10 = scmp.lt.u32.totalorder %s1513_s27, %s1572_s3 }
 0x117   : > { %p1271_p11 = scmp.lt.u32.totalorder %s1269_s8, %s1265_s5  ;;  %p1273_p13 = scmp.lt.u32.totalorder %s1265_s5, %s1513_s27 }
 0x118   : > { %p1267_p7 = pnand %p1266_p6, %p1395_p4 }
 0x119   : > { %p1272_p12 = por %p1271_p11, %p1270_p10 }
 0x11a   : > { %p1268_p9 = pneg %p1267_p7 }
 0x11b   : > { %p1274_p0 = por %p1273_p13, %p1272_p12 }
 0x11d   : > { %p1275_p1 = pnand %p1274_p0, %p1268_p9 }
 0x11f   : > { %1278 = shalt.err (!%p1275_p1)
}
 0x120   : > { %s1333_s11 = smov 64   ;;  %s1334_s18 = smov 4  }
 0x121   : > { %1175 = dma.vmem_to_hbm [thread:$0]  (%p1395_p4), %s1515_s21, 2048, %s1513_s27, %s1523_s15, %s1333_s11, %s1333_s11, %s1334_s18  }
 0x122 PF: > { %p1181_p2 = scmp.ge.s32.totalorder %s1329_s17, 2  ;;  %s823_s19 = sand.u32 1, %s1309_s12  }
 0x123   : > { %s824_s23 = scalar_lea.sflag [#allocation3], %s823_s19 }
 0x124   : > { %p1178_p3 = pnand %p1181_p2, %p1402_p8 }
 0x126   : > { %1304 = dma.done.wait (!%p1178_p3), %s824_s23, 2048  }
 0x127   : > { %1306 = vsyncadd (!%p1178_p3), %s824_s23, 4294965248  ;;  %s16_s17 = sadd.s32 1, %s1329_s17   ;;  %s1575_s12 = smov %s1313_s13 }
 0x128   : > { %p13_p5 = scmp.ge.s32.totalorder %s16_s17, 4   ;;  %s1576_s13 = smov %s1317_s14 }
 0x129   : > { %s1577_s14 = smov %s1408_s25  ;;  %s1578_s15 = smov %s1325_s16 }
 0x12a   : > { %s1579_s16 = smov %s1581_s20  ;;  %15 = sbr.rel (!%p13_p5) target bundleno = 4 (0x4), region = 73 }
 0x131   :  { %829 = vsyncpa [#allocation3], 1 }
 0x132   :  { %831 = vsyncpa [#allocation3 + $0x1], 1 }

</bundles_post_ra>
